<compile_context>
chip_gen: v6e
topology: v6e:2x2x1
jax: 0.10.0
libtpu: 0.0.40
codegen_flags: <defaults>
</compile_context>

<pallas_src>
import functools
import math

import jax
import jax.numpy as jnp
from jax import lax
from jax.experimental import pallas as pl
from jax.experimental.pallas import tpu as pltpu

DIM = 64                         # feature dim
TIME_DIM = 16                    # fourier feature dim
HALF = TIME_DIM // 2
LABEL_DIM = 40
IN_K = 128                       # fused input width: 64 + 16 + 40 padded -> 128
FILM_DIM = 4 * DIM               # gamma1 | beta1 | gamma2 | beta2
Y_PAD = IN_K - DIM - TIME_DIM    # y padded from 40 -> 48 lanes


def _round_up(n, m):
    return ((n + m - 1) // m) * m


def _pick_tb(batch, tb):
    """Clamp the batch tile: never exceed the padded batch, and leave >= 2 grid
    steps when possible so ("parallel",) spreads work over v7x's two TCs."""
    tb = min(tb, _round_up(batch, 8))
    half = _round_up(pl.cdiv(batch, 2), 8)
    if 8 <= half < tb:
        tb = half
    return max(8, _round_up(tb, 8))


# ----------------------------------------------------------------------------
# General forward kernel (x, t, y all per-row)
# ----------------------------------------------------------------------------
def flow_kernel(x_ref, t_ref, y_ref, freq_ref, win_ref, bin_ref, w64_ref, b64_ref,
                out_ref):
    f32 = jnp.float32
    x = x_ref[...]                 # (TB, 64)  f32
    t = t_ref[...]                 # (TB, 1)   f32
    y = y_ref[...]                 # (TB, 48)  f32 (zero-padded label)

    def mm(a, w):
        # MXU matmul: operands cast to the weight (compute) dtype, f32 accum.
        return jnp.dot(a.astype(w.dtype), w, preferred_element_type=f32)

    # fourier_features(t, 16): freq = 2^k * pi, k = 0..7 (resident input, not a
    # captured constant).
    args = t * freq_ref[...]                                            # (TB, 8)
    sc = jnp.concatenate([jnp.sin(args), jnp.cos(args)], axis=-1)       # (TB, 16)

    # One block-diagonal K=128 matmul fuses block1's first linear and both FiLM
    # linears: z = [x|sc|y] @ blockdiag(W1x; W1t; Wfilm) + [b1a|bg1|bb1|bg2|bb2]
    xin = jnp.concatenate([x, sc, y], axis=-1)                          # (TB, 128)
    z = mm(xin, win_ref[...]) + bin_ref[...]                            # (TB, 320)
    h = z[:, 0:DIM]
    g1 = z[:, DIM:2 * DIM]
    be1 = z[:, 2 * DIM:3 * DIM]
    g2 = z[:, 3 * DIM:4 * DIM]
    be2 = z[:, 4 * DIM:5 * DIM]

    # block1 tail
    h = jnp.maximum(h, 0.0)
    h = mm(h, w64_ref[0]) + b64_ref[1:2, :]
    # film1
    h = g1 * h + be1
    # block2 + residual
    r = jnp.maximum(mm(h, w64_ref[1]) + b64_ref[2:3, :], 0.0)
    h = h + mm(r, w64_ref[2]) + b64_ref[3:4, :]
    # film2
    h = g2 * h + be2
    # block3 + residual
    r = jnp.maximum(mm(h, w64_ref[3]) + b64_ref[4:5, :], 0.0)
    h = h + mm(r, w64_ref[4]) + b64_ref[5:6, :]
    # out
    out_ref[...] = (mm(h, w64_ref[5]) + b64_ref[6:7, :]).astype(out_ref.dtype)


# ----------------------------------------------------------------------------
# Fused RK4 transform kernel: whole integration in one pallas_call.
# FiLM (y-dependent) and the time embedding (t-dependent) are precomputed in
# the wrapper since they are invariant across the integration.
# ----------------------------------------------------------------------------
def flow_rk4_kernel(x_ref, film_ref, tbias_ref, w1x_ref, w64_ref, b64_ref,
                    out_ref, *, dt, nstep):
    f32 = jnp.float32

    def mm(a, w):
        return jnp.dot(a.astype(w.dtype), w, preferred_element_type=f32)

    film = film_ref[...]                              # (TB, 256) f32
    g1 = film[:, 0:DIM]
    be1 = film[:, DIM:2 * DIM]
    g2 = film[:, 2 * DIM:3 * DIM]
    be2 = film[:, 3 * DIM:4 * DIM]

    w1x = w1x_ref[...]
    w_1b = w64_ref[0]
    w_2a = w64_ref[1]
    w_2b = w64_ref[2]
    w_3a = w64_ref[3]
    w_3b = w64_ref[4]
    w_o = w64_ref[5]
    b = b64_ref[...]                                  # (7, 64) f32

    def stage(xi, tbias):
        # tbias = fourier(t) @ W1t + b1a, a (1,64) per-stage bias.
        h = jnp.maximum(mm(xi, w1x) + tbias, 0.0)
        h = mm(h, w_1b) + b[1:2]
        h = g1 * h + be1
        r = jnp.maximum(mm(h, w_2a) + b[2:3], 0.0)
        h = h + mm(r, w_2b) + b[3:4]
        h = g2 * h + be2
        r = jnp.maximum(mm(h, w_3a) + b[4:5], 0.0)
        h = h + mm(r, w_3b) + b[5:6]
        return mm(h, w_o) + b[6:7]

    def step_body(s, xi):
        tbl = tbias_ref[s]                            # (8, 64), rows 0..3 used
        k1 = stage(xi, tbl[0:1])
        k2 = stage(xi + (0.5 * dt) * k1, tbl[1:2])
        k3 = stage(xi + (0.5 * dt) * k2, tbl[2:3])
        k4 = stage(xi + dt * k3, tbl[3:4])
        return xi + (dt / 6.0) * (k1 + 2.0 * (k2 + k3) + k4)

    xi = lax.fori_loop(0, nstep, step_body, x_ref[...].astype(f32))
    out_ref[...] = xi.astype(out_ref.dtype)


# ----------------------------------------------------------------------------
# Parameter packing
# ----------------------------------------------------------------------------
def pack_params(params, compute_dtype=jnp.bfloat16):
    """Pack the 22 (in,out)/(1,out) tensors.

    Matmul weights are stored in `compute_dtype` (bf16 by default); biases and
    host-side precompute tables stay f32.
    """
    (w1a, b1a, w1b, b1b, wg1, bg1, wb1, bb1,
     w2a, b2a, w2b, b2b, wg2, bg2, wb2, bb2,
     w3a, b3a, w3b, b3b, wo, bo) = params
    f32 = jnp.float32

    wfilm = jnp.concatenate([wg1, wb1, wg2, wb2], axis=1)               # (40, 256)
    win = jnp.zeros((IN_K, DIM + FILM_DIM), f32)                        # (128, 320)
    win = win.at[0:DIM, 0:DIM].set(w1a[0:DIM])                          # x part
    win = win.at[DIM:DIM + TIME_DIM, 0:DIM].set(w1a[DIM:DIM + TIME_DIM])  # sc part
    win = win.at[DIM + TIME_DIM:DIM + TIME_DIM + LABEL_DIM, DIM:].set(wfilm)
    b_in = jnp.concatenate([b1a, bg1, bb1, bg2, bb2], axis=1)           # (1, 320)

    w64 = jnp.stack([w1b, w2a, w2b, w3a, w3b, wo])                      # (6, 64, 64)
    b64 = jnp.concatenate([b1a, b1b, b2a, b2b, b3a, b3b, bo], axis=0)   # (7, 64) (row 0 unused)
    freq = ((2.0 ** jnp.arange(HALF, dtype=f32)) * jnp.pi)[None]        # (1, 8)

    return dict(
        win=win.astype(compute_dtype),
        bin=b_in.astype(f32),
        w64=w64.astype(compute_dtype),
        b64=b64.astype(f32),
        w1x=w1a[0:DIM].astype(compute_dtype),      # transform kernel
        w1t=w1a[DIM:DIM + TIME_DIM].astype(f32),   # transform wrapper (time bias)
        wfilm=wfilm.astype(f32),                   # transform wrapper (FiLM hoist)
        bfilm=jnp.concatenate([bg1, bb1, bg2, bb2], axis=1).astype(f32),
        b1a=b1a.astype(f32),
        freq=freq,
    )


# ----------------------------------------------------------------------------
# Wrappers
# ----------------------------------------------------------------------------
def flow_forward(x, t, y, packed, *, tb=2048):
    """x:(B,64), t:(B,1), y:(B,40) -> (B,64)."""
    B = x.shape[0]
    tb = _pick_tb(B, tb)
    Bp = _round_up(B, tb)

    y48 = jnp.pad(y.astype(jnp.float32), ((0, 0), (0, Y_PAD - LABEL_DIM)))
    x = x.astype(jnp.float32)
    t = t.astype(jnp.float32)
    if Bp != B:
        pad = Bp - B
        x = jnp.pad(x, ((0, pad), (0, 0)))
        t = jnp.pad(t, ((0, pad), (0, 0)))
        y48 = jnp.pad(y48, ((0, pad), (0, 0)))

    grid = (Bp // tb,)
    out = pl.pallas_call(
        flow_kernel,
        out_shape=jax.ShapeDtypeStruct((Bp, DIM), jnp.float32),
        grid=grid,
        in_specs=[
            pl.BlockSpec((tb, DIM), lambda i: (i, 0)),                 # x (streamed)
            pl.BlockSpec((tb, 1), lambda i: (i, 0)),                   # t (streamed)
            pl.BlockSpec((tb, Y_PAD), lambda i: (i, 0)),               # y (streamed)
            pl.BlockSpec(packed['freq'].shape, lambda i: (0, 0)),      # resident
            pl.BlockSpec(packed['win'].shape, lambda i: (0, 0)),       # resident
            pl.BlockSpec(packed['bin'].shape, lambda i: (0, 0)),       # resident
            pl.BlockSpec(packed['w64'].shape, lambda i: (0, 0, 0)),    # resident
            pl.BlockSpec(packed['b64'].shape, lambda i: (0, 0)),       # resident
        ],
        out_specs=pl.BlockSpec((tb, DIM), lambda i: (i, 0)),
        compiler_params=pltpu.CompilerParams(
            dimension_semantics=("parallel",)),
    )(x, t, y48, packed['freq'], packed['win'], packed['bin'],
      packed['w64'], packed['b64'])

    return out[:B] if Bp != B else out


def flow_transform(x, y, packed, *, steps=20, tb=1024):
    """Flow.transform: fixed-grid RK4 over t in [0,1]; whole integration fused
    into a single pallas_call (x read once, final state written once)."""
    # TODO(synk): torchdiffeq's method='rk4' uses the 3/8-rule variant
    # (rk4_alt_step_func); classic RK4 is implemented here.
    f32 = jnp.float32
    B = x.shape[0]
    x = x.astype(f32)
    y = y.astype(f32)

    dt = 1.0 / (steps - 1)
    ts = jnp.linspace(0.0, 1.0, steps, dtype=f32)
    t0, t1 = ts[:-1], ts[1:]
    tm = 0.5 * (t0 + t1)
    stage_t = jnp.stack([t0, tm, tm, t1], axis=1)                       # (S, 4)
    freq = packed['freq'][0]                                            # (8,)
    args = stage_t[:, :, None] * freq[None, None, :]                    # (S, 4, 8)
    sc = jnp.concatenate([jnp.sin(args), jnp.cos(args)], axis=-1)       # (S, 4, 16)
    # Per-stage time bias (hoisted out of the ODE loop); fold in b1a.
    tbias = jnp.einsum('sak,kd->sad', sc, packed['w1t']) + packed['b1a'][None]
    tbias = jnp.pad(tbias, ((0, 0), (0, 4), (0, 0)))                    # (S, 8, 64)

    # FiLM is y-only -> compute once for the whole integration.
    film = (y @ packed['wfilm'] + packed['bfilm']).astype(f32)          # (B, 256)

    tb = _pick_tb(B, tb)
    Bp = _round_up(B, tb)
    if Bp != B:
        pad = Bp - B
        x = jnp.pad(x, ((0, pad), (0, 0)))
        film = jnp.pad(film, ((0, pad), (0, 0)))

    kernel = functools.partial(flow_rk4_kernel, dt=float(dt), nstep=steps - 1)
    out = pl.pallas_call(
        kernel,
        out_shape=jax.ShapeDtypeStruct((Bp, DIM), f32),
        grid=(Bp // tb,),
        in_specs=[
            pl.BlockSpec((tb, DIM), lambda i: (i, 0)),                  # x (streamed)
            pl.BlockSpec((tb, FILM_DIM), lambda i: (i, 0)),             # film (streamed)
            pl.BlockSpec(tbias.shape, lambda i: (0, 0, 0)),             # resident
            pl.BlockSpec(packed['w1x'].shape, lambda i: (0, 0)),        # resident
            pl.BlockSpec(packed['w64'].shape, lambda i: (0, 0, 0)),     # resident
            pl.BlockSpec(packed['b64'].shape, lambda i: (0, 0)),        # resident
        ],
        out_specs=pl.BlockSpec((tb, DIM), lambda i: (i, 0)),
        input_output_aliases={0: 0},
        compiler_params=pltpu.CompilerParams(
            dimension_semantics=("parallel",)),
    )(x, film, tbias, packed['w1x'], packed['w64'], packed['b64'])

    return out[:B] if Bp != B else out


# ----------------------------------------------------------------------------
# Synthetic weights + pure-JAX references
# ----------------------------------------------------------------------------
def init_params(key):
    """Deterministic synthetic weights. Weights are (in, out); biases (1, out)."""
    shapes = [
        (DIM + TIME_DIM, DIM), (1, DIM), (DIM, DIM), (1, DIM),      # block1
        (LABEL_DIM, DIM), (1, DIM), (LABEL_DIM, DIM), (1, DIM),     # film1 (gamma, beta)
        (DIM, DIM), (1, DIM), (DIM, DIM), (1, DIM),                 # block2
        (LABEL_DIM, DIM), (1, DIM), (LABEL_DIM, DIM), (1, DIM),     # film2
        (DIM, DIM), (1, DIM), (DIM, DIM), (1, DIM),                 # block3
        (DIM, DIM), (1, DIM),                                       # out
    ]
    keys = jax.random.split(key, len(shapes))
    return [jax.random.normal(k, s, jnp.float32) * 0.05 for k, s in zip(keys, shapes)]


def flow_forward_ref(x, t, y, params):
    (w1a, b1a, w1b, b1b, wg1, bg1, wb1, bb1,
     w2a, b2a, w2b, b2b, wg2, bg2, wb2, bb2,
     w3a, b3a, w3b, b3b, wo, bo) = params
    freq = (2.0 ** jnp.arange(HALF, dtype=jnp.float32)) * jnp.pi
    args = t * freq[None, :]
    tf = jnp.concatenate([jnp.sin(args), jnp.cos(args)], axis=-1)
    h = jnp.concatenate([x, tf], axis=-1)
    h = jnp.maximum(h @ w1a + b1a, 0.0) @ w1b + b1b
    h = (y @ wg1 + bg1) * h + (y @ wb1 + bb1)
    h = h + (jnp.maximum(h @ w2a + b2a, 0.0) @ w2b + b2b)
    h = (y @ wg2 + bg2) * h + (y @ wb2 + bb2)
    h = h + (jnp.maximum(h @ w3a + b3a, 0.0) @ w3b + b3b)
    return h @ wo + bo


def flow_transform_ref(x, y, params, steps=20):
    ts = jnp.linspace(0.0, 1.0, steps)

    def f(xi, ti):
        t_col = jnp.full((x.shape[0], 1), ti, jnp.float32)
        return flow_forward_ref(xi, t_col, y, params)

    xi = x
    for i in range(steps - 1):
        t0, t1 = ts[i], ts[i + 1]
        dt = t1 - t0
        k1 = f(xi, t0)
        k2 = f(xi + 0.5 * dt * k1, t0 + 0.5 * dt)
        k3 = f(xi + 0.5 * dt * k2, t0 + 0.5 * dt)
        k4 = f(xi + dt * k3, t1)
        xi = xi + (dt / 6.0) * (k1 + 2.0 * k2 + 2.0 * k3 + k4)
    return xi


# ----------------------------------------------------------------------------
# Self-test
# ----------------------------------------------------------------------------
if __name__ == "__main__":
    key = jax.random.PRNGKey(0)
    kx, kt, ky, kp = jax.random.split(key, 4)

    B = 8
    x = jax.random.normal(kx, (B, DIM), jnp.float32)
    t = jax.random.uniform(kt, (B, 1), jnp.float32)
    y = jax.random.normal(ky, (B, LABEL_DIM), jnp.float32)
    params = init_params(kp)

    packed_f32 = pack_params(params, jnp.float32)
    packed_bf16 = pack_params(params)                     # bf16 default

    # f32 compute path
    out = jax.block_until_ready(flow_forward(x, t, y, packed_f32))
    ref = flow_forward_ref(x, t, y, params)
    assert out.shape == (B, DIM)
    assert jnp.allclose(out, ref, atol=5e-3, rtol=5e-3), "f32 forward mismatch"

    # multi-tile grid + padding path (B not a multiple of the tile)
    B2 = 50
    kx2, kt2, ky2 = jax.random.split(jax.random.PRNGKey(1), 3)
    x2 = jax.random.normal(kx2, (B2, DIM), jnp.float32)
    t2 = jax.random.uniform(kt2, (B2, 1), jnp.float32)
    y2 = jax.random.normal(ky2, (B2, LABEL_DIM), jnp.float32)
    out2 = jax.block_until_ready(flow_forward(x2, t2, y2, packed_f32, tb=16))
    ref2 = flow_forward_ref(x2, t2, y2, params)
    assert jnp.allclose(out2, ref2, atol=5e-3, rtol=5e-3), "grid/padding mismatch"

    # bf16 matmul-operand default path (f32 accumulation / elementwise)
    out_bf16 = jax.block_until_ready(flow_forward(x, t, y, packed_bf16))
    assert jnp.allclose(out_bf16, ref, atol=5e-2, rtol=5e-2), "bf16 forward mismatch"

    # fused RK4 transform: whole integration in a single pallas_call
    B3, steps = 20, 6
    kx3, ky3 = jax.random.split(jax.random.PRNGKey(2), 2)
    x3 = jax.random.normal(kx3, (B3, DIM), jnp.float32)
    y3 = jax.random.normal(ky3, (B3, LABEL_DIM), jnp.float32)
    xf = jax.block_until_ready(flow_transform(x3, y3, packed_f32, steps=steps, tb=8))
    xf_ref = flow_transform_ref(x3, y3, params, steps=steps)
    assert xf.shape == (B3, DIM)
    assert jnp.allclose(xf, xf_ref, atol=1e-2, rtol=1e-2), "rk4 transform mismatch"

    # bf16 weights on the transform path (looser: error compounds over stages)
    xf_bf16 = jax.block_until_ready(
        flow_transform(x3, y3, packed_bf16, steps=steps, tb=8))
    assert jnp.allclose(xf_bf16, xf_ref, atol=1e-1, rtol=1e-1), "bf16 rk4 mismatch"

    print("KERNEL_OK")
</pallas_src>

<mosaic_0001>
module attributes {stable_mosaic.version = 11 : i64} {
  func.func @flow_kernel(%arg0: i32, %arg1: memref<8x64xf32, #tpu.memory_space<vmem>>, %arg2: memref<8x1xf32, #tpu.memory_space<vmem>>, %arg3: memref<8x48xf32, #tpu.memory_space<vmem>>, %arg4: memref<1x8xf32, #tpu.memory_space<vmem>>, %arg5: memref<128x320xf32, #tpu.memory_space<vmem>>, %arg6: memref<1x320xf32, #tpu.memory_space<vmem>>, %arg7: memref<6x64x64xf32, #tpu.memory_space<vmem>>, %arg8: memref<7x64xf32, #tpu.memory_space<vmem>>, %arg9: memref<8x64xf32, #tpu.memory_space<vmem>>) attributes {dimension_semantics = [#tpu.dimension_semantics<parallel>], iteration_bounds = array<i64: 1>, scalar_prefetch = 0 : i64, scratch_operands = 0 : i64, tpu.core_type = #tpu.core_type<tc>, window_params = [{transform_indices = @transform_0, window_bounds = array<i64: 8, 64>}, {transform_indices = @transform_1, window_bounds = array<i64: 8, 1>}, {transform_indices = @transform_2, window_bounds = array<i64: 8, 48>}, {pipeline_mode = #tpu.pipeline_mode<synchronous>, transform_indices = @transform_3, window_bounds = array<i64: 1, 8>}, {pipeline_mode = #tpu.pipeline_mode<synchronous>, transform_indices = @transform_4, window_bounds = array<i64: 128, 320>}, {pipeline_mode = #tpu.pipeline_mode<synchronous>, transform_indices = @transform_5, window_bounds = array<i64: 1, 320>}, {pipeline_mode = #tpu.pipeline_mode<synchronous>, transform_indices = @transform_6, window_bounds = array<i64: 6, 64, 64>}, {pipeline_mode = #tpu.pipeline_mode<synchronous>, transform_indices = @transform_7, window_bounds = array<i64: 7, 64>}, {transform_indices = @transform_8, window_bounds = array<i64: 8, 64>}]} {
    %c0 = arith.constant 0 : index
    %c0_0 = arith.constant 0 : index
    %0 = vector.load %arg1[%c0, %c0_0] : memref<8x64xf32, #tpu.memory_space<vmem>>, vector<8x64xf32>
    %c0_1 = arith.constant 0 : index
    %c0_2 = arith.constant 0 : index
    %1 = vector.load %arg2[%c0_1, %c0_2] : memref<8x1xf32, #tpu.memory_space<vmem>>, vector<8x1xf32>
    %c0_3 = arith.constant 0 : index
    %c0_4 = arith.constant 0 : index
    %2 = vector.load %arg3[%c0_3, %c0_4] : memref<8x48xf32, #tpu.memory_space<vmem>>, vector<8x48xf32>
    %c0_5 = arith.constant 0 : index
    %c0_6 = arith.constant 0 : index
    %3 = vector.load %arg4[%c0_5, %c0_6] : memref<1x8xf32, #tpu.memory_space<vmem>>, vector<1x8xf32>
    %4 = vector.broadcast %1 : vector<8x1xf32> to vector<8x8xf32>
    %5 = vector.broadcast %3 : vector<1x8xf32> to vector<8x8xf32>
    %6 = arith.mulf %4, %5 : vector<8x8xf32>
    %7 = math.sin %6 : vector<8x8xf32>
    %8 = math.cos %6 : vector<8x8xf32>
    %9 = tpu.concatenate %7, %8 in 1 : vector<8x8xf32>, vector<8x8xf32> -> vector<8x16xf32>
    %10 = tpu.concatenate %0, %9, %2 in 1 : vector<8x64xf32>, vector<8x16xf32>, vector<8x48xf32> -> vector<8x128xf32>
    %c0_7 = arith.constant 0 : index
    %c0_8 = arith.constant 0 : index
    %11 = vector.load %arg5[%c0_7, %c0_8] : memref<128x320xf32, #tpu.memory_space<vmem>>, vector<128x320xf32>
    %cst = arith.constant dense<0.000000e+00> : vector<8x320xf32>
    %12 = tpu.matmul %10, %11, %cst {dimension_numbers = #tpu.dot_dimension_numbers<[1], [0], [0], [1], [0, 0, 1, 1], [], []>} : vector<8x128xf32>, vector<128x320xf32>, vector<8x320xf32> -> vector<8x320xf32>
    %c0_9 = arith.constant 0 : index
    %c0_10 = arith.constant 0 : index
    %13 = vector.load %arg6[%c0_9, %c0_10] : memref<1x320xf32, #tpu.memory_space<vmem>>, vector<1x320xf32>
    %14 = vector.broadcast %13 : vector<1x320xf32> to vector<8x320xf32>
    %15 = arith.addf %12, %14 : vector<8x320xf32>
    %16 = vector.extract_strided_slice %15 {offsets = [0, 0], sizes = [8, 64], strides = [1, 1]} : vector<8x320xf32> to vector<8x64xf32>
    %17 = vector.extract_strided_slice %15 {offsets = [0, 64], sizes = [8, 64], strides = [1, 1]} : vector<8x320xf32> to vector<8x64xf32>
    %18 = vector.extract_strided_slice %15 {offsets = [0, 128], sizes = [8, 64], strides = [1, 1]} : vector<8x320xf32> to vector<8x64xf32>
    %19 = vector.extract_strided_slice %15 {offsets = [0, 192], sizes = [8, 64], strides = [1, 1]} : vector<8x320xf32> to vector<8x64xf32>
    %20 = vector.extract_strided_slice %15 {offsets = [0, 256], sizes = [8, 64], strides = [1, 1]} : vector<8x320xf32> to vector<8x64xf32>
    %cst_11 = arith.constant 0.000000e+00 : f32
    %21 = vector.broadcast %cst_11 : f32 to vector<8x64xf32>
    %22 = arith.maximumf %16, %21 : vector<8x64xf32>
    %c0_12 = arith.constant 0 : index
    %c0_13 = arith.constant 0 : index
    %c0_14 = arith.constant 0 : index
    %23 = vector.load %arg7[%c0_12, %c0_13, %c0_14] : memref<6x64x64xf32, #tpu.memory_space<vmem>>, vector<1x64x64xf32>
    %24 = vector.shape_cast %23 : vector<1x64x64xf32> to vector<64x64xf32>
    %cst_15 = arith.constant dense<0.000000e+00> : vector<8x64xf32>
    %25 = tpu.matmul %22, %24, %cst_15 {dimension_numbers = #tpu.dot_dimension_numbers<[1], [0], [0], [1], [0, 0, 1, 1], [], []>} : vector<8x64xf32>, vector<64x64xf32>, vector<8x64xf32> -> vector<8x64xf32>
    %c1 = arith.constant 1 : index
    %c0_16 = arith.constant 0 : index
    %26 = vector.load %arg8[%c1, %c0_16] : memref<7x64xf32, #tpu.memory_space<vmem>>, vector<1x64xf32>
    %27 = vector.broadcast %26 : vector<1x64xf32> to vector<8x64xf32>
    %28 = arith.addf %25, %27 : vector<8x64xf32>
    %29 = arith.mulf %17, %28 : vector<8x64xf32>
    %30 = arith.addf %29, %18 : vector<8x64xf32>
    %c1_17 = arith.constant 1 : index
    %c0_18 = arith.constant 0 : index
    %c0_19 = arith.constant 0 : index
    %31 = vector.load %arg7[%c1_17, %c0_18, %c0_19] : memref<6x64x64xf32, #tpu.memory_space<vmem>>, vector<1x64x64xf32>
    %32 = vector.shape_cast %31 : vector<1x64x64xf32> to vector<64x64xf32>
    %cst_20 = arith.constant dense<0.000000e+00> : vector<8x64xf32>
    %33 = tpu.matmul %30, %32, %cst_20 {dimension_numbers = #tpu.dot_dimension_numbers<[1], [0], [0], [1], [0, 0, 1, 1], [], []>} : vector<8x64xf32>, vector<64x64xf32>, vector<8x64xf32> -> vector<8x64xf32>
    %c2 = arith.constant 2 : index
    %c0_21 = arith.constant 0 : index
    %34 = vector.load %arg8[%c2, %c0_21] : memref<7x64xf32, #tpu.memory_space<vmem>>, vector<1x64xf32>
    %35 = vector.broadcast %34 : vector<1x64xf32> to vector<8x64xf32>
    %36 = arith.addf %33, %35 : vector<8x64xf32>
    %cst_22 = arith.constant 0.000000e+00 : f32
    %37 = vector.broadcast %cst_22 : f32 to vector<8x64xf32>
    %38 = arith.maximumf %36, %37 : vector<8x64xf32>
    %c2_23 = arith.constant 2 : index
    %c0_24 = arith.constant 0 : index
    %c0_25 = arith.constant 0 : index
    %39 = vector.load %arg7[%c2_23, %c0_24, %c0_25] : memref<6x64x64xf32, #tpu.memory_space<vmem>>, vector<1x64x64xf32>
    %40 = vector.shape_cast %39 : vector<1x64x64xf32> to vector<64x64xf32>
    %cst_26 = arith.constant dense<0.000000e+00> : vector<8x64xf32>
    %41 = tpu.matmul %38, %40, %cst_26 {dimension_numbers = #tpu.dot_dimension_numbers<[1], [0], [0], [1], [0, 0, 1, 1], [], []>} : vector<8x64xf32>, vector<64x64xf32>, vector<8x64xf32> -> vector<8x64xf32>
    %42 = arith.addf %30, %41 : vector<8x64xf32>
    %c3 = arith.constant 3 : index
    %c0_27 = arith.constant 0 : index
    %43 = vector.load %arg8[%c3, %c0_27] : memref<7x64xf32, #tpu.memory_space<vmem>>, vector<1x64xf32>
    %44 = vector.broadcast %43 : vector<1x64xf32> to vector<8x64xf32>
    %45 = arith.addf %42, %44 : vector<8x64xf32>
    %46 = arith.mulf %19, %45 : vector<8x64xf32>
    %47 = arith.addf %46, %20 : vector<8x64xf32>
    %c3_28 = arith.constant 3 : index
    %c0_29 = arith.constant 0 : index
    %c0_30 = arith.constant 0 : index
    %48 = vector.load %arg7[%c3_28, %c0_29, %c0_30] : memref<6x64x64xf32, #tpu.memory_space<vmem>>, vector<1x64x64xf32>
    %49 = vector.shape_cast %48 : vector<1x64x64xf32> to vector<64x64xf32>
    %cst_31 = arith.constant dense<0.000000e+00> : vector<8x64xf32>
    %50 = tpu.matmul %47, %49, %cst_31 {dimension_numbers = #tpu.dot_dimension_numbers<[1], [0], [0], [1], [0, 0, 1, 1], [], []>} : vector<8x64xf32>, vector<64x64xf32>, vector<8x64xf32> -> vector<8x64xf32>
    %c4 = arith.constant 4 : index
    %c0_32 = arith.constant 0 : index
    %51 = vector.load %arg8[%c4, %c0_32] : memref<7x64xf32, #tpu.memory_space<vmem>>, vector<1x64xf32>
    %52 = vector.broadcast %51 : vector<1x64xf32> to vector<8x64xf32>
    %53 = arith.addf %50, %52 : vector<8x64xf32>
    %cst_33 = arith.constant 0.000000e+00 : f32
    %54 = vector.broadcast %cst_33 : f32 to vector<8x64xf32>
    %55 = arith.maximumf %53, %54 : vector<8x64xf32>
    %c4_34 = arith.constant 4 : index
    %c0_35 = arith.constant 0 : index
    %c0_36 = arith.constant 0 : index
    %56 = vector.load %arg7[%c4_34, %c0_35, %c0_36] : memref<6x64x64xf32, #tpu.memory_space<vmem>>, vector<1x64x64xf32>
    %57 = vector.shape_cast %56 : vector<1x64x64xf32> to vector<64x64xf32>
    %cst_37 = arith.constant dense<0.000000e+00> : vector<8x64xf32>
    %58 = tpu.matmul %55, %57, %cst_37 {dimension_numbers = #tpu.dot_dimension_numbers<[1], [0], [0], [1], [0, 0, 1, 1], [], []>} : vector<8x64xf32>, vector<64x64xf32>, vector<8x64xf32> -> vector<8x64xf32>
    %59 = arith.addf %47, %58 : vector<8x64xf32>
    %c5 = arith.constant 5 : index
    %c0_38 = arith.constant 0 : index
    %60 = vector.load %arg8[%c5, %c0_38] : memref<7x64xf32, #tpu.memory_space<vmem>>, vector<1x64xf32>
    %61 = vector.broadcast %60 : vector<1x64xf32> to vector<8x64xf32>
    %62 = arith.addf %59, %61 : vector<8x64xf32>
    %c5_39 = arith.constant 5 : index
    %c0_40 = arith.constant 0 : index
    %c0_41 = arith.constant 0 : index
    %63 = vector.load %arg7[%c5_39, %c0_40, %c0_41] : memref<6x64x64xf32, #tpu.memory_space<vmem>>, vector<1x64x64xf32>
    %64 = vector.shape_cast %63 : vector<1x64x64xf32> to vector<64x64xf32>
    %cst_42 = arith.constant dense<0.000000e+00> : vector<8x64xf32>
    %65 = tpu.matmul %62, %64, %cst_42 {dimension_numbers = #tpu.dot_dimension_numbers<[1], [0], [0], [1], [0, 0, 1, 1], [], []>} : vector<8x64xf32>, vector<64x64xf32>, vector<8x64xf32> -> vector<8x64xf32>
    %c6 = arith.constant 6 : index
    %c0_43 = arith.constant 0 : index
    %66 = vector.load %arg8[%c6, %c0_43] : memref<7x64xf32, #tpu.memory_space<vmem>>, vector<1x64xf32>
    %67 = vector.broadcast %66 : vector<1x64xf32> to vector<8x64xf32>
    %68 = arith.addf %65, %67 : vector<8x64xf32>
    %c0_44 = arith.constant 0 : index
    %c0_45 = arith.constant 0 : index
    %69 = vector.load %arg9[%c0_44, %c0_45] : memref<8x64xf32, #tpu.memory_space<vmem>>, vector<8x64xf32>
    tpu.vector_store %arg9[%c0_44, %c0_45], %68 {strides = array<i32>} : memref<8x64xf32, #tpu.memory_space<vmem>>, vector<8x64xf32>,
    return
  }
  func.func @transform_0(%arg0: i32) -> (i32, i32) {
    %c0_i32 = arith.constant 0 : i32
    %c0_i32_0 = arith.constant 0 : i32
    return %arg0, %c0_i32 : i32, i32
  }
  func.func @transform_1(%arg0: i32) -> (i32, i32) {
    %c0_i32 = arith.constant 0 : i32
    %c0_i32_0 = arith.constant 0 : i32
    return %arg0, %c0_i32 : i32, i32
  }
  func.func @transform_2(%arg0: i32) -> (i32, i32) {
    %c0_i32 = arith.constant 0 : i32
    %c0_i32_0 = arith.constant 0 : i32
    return %arg0, %c0_i32 : i32, i32
  }
  func.func @transform_3(%arg0: i32) -> (i32, i32) {
    %c0_i32 = arith.constant 0 : i32
    %c0_i32_0 = arith.constant 0 : i32
    %c0_i32_1 = arith.constant 0 : i32
    return %c0_i32, %c0_i32_0 : i32, i32
  }
  func.func @transform_4(%arg0: i32) -> (i32, i32) {
    %c0_i32 = arith.constant 0 : i32
    %c0_i32_0 = arith.constant 0 : i32
    %c0_i32_1 = arith.constant 0 : i32
    return %c0_i32, %c0_i32_0 : i32, i32
  }
  func.func @transform_5(%arg0: i32) -> (i32, i32) {
    %c0_i32 = arith.constant 0 : i32
    %c0_i32_0 = arith.constant 0 : i32
    %c0_i32_1 = arith.constant 0 : i32
    return %c0_i32, %c0_i32_0 : i32, i32
  }
  func.func @transform_6(%arg0: i32) -> (i32, i32, i32) {
    %c0_i32 = arith.constant 0 : i32
    %c0_i32_0 = arith.constant 0 : i32
    %c0_i32_1 = arith.constant 0 : i32
    %c0_i32_2 = arith.constant 0 : i32
    return %c0_i32, %c0_i32_0, %c0_i32_1 : i32, i32, i32
  }
  func.func @transform_7(%arg0: i32) -> (i32, i32) {
    %c0_i32 = arith.constant 0 : i32
    %c0_i32_0 = arith.constant 0 : i32
    %c0_i32_1 = arith.constant 0 : i32
    return %c0_i32, %c0_i32_0 : i32, i32
  }
  func.func @transform_8(%arg0: i32) -> (i32, i32) {
    %c0_i32 = arith.constant 0 : i32
    %c0_i32_0 = arith.constant 0 : i32
    return %arg0, %c0_i32 : i32, i32
  }
}

</mosaic_0001>

<bundles_post_ra>
// kernel: tpu_custom_call.1
= control target key start
LH: loop header
LB: loop body
LE: loop exit
PB: predicated region body
PF: predicated region fallthrough
CT: control target
= control target key end

     0   :  { %v1383_v1 = vmov 0   ;;  %s1908_s0 = inlined_call_operand.vmem [shape: f32[8,64], index: 0, kind: input, shape index: {}]   ;;  %s1909_s1 = inlined_call_operand.vmem [shape: f32[8,1], index: 1, kind: input, shape index: {}]   ;;  %s1910_s2 = inlined_call_operand.vmem [shape: f32[8,48], index: 2, kind: input, shape index: {}]   ;;  %s1911_s3 = inlined_call_operand.vmem [shape: f32[1,8], index: 3, kind: input, shape index: {}]   ;;  %s1912_s4 = inlined_call_operand.vmem [shape: f32[128,320], index: 4, kind: input, shape index: {}]   ;;  %s1913_s5 = inlined_call_operand.vmem [shape: f32[1,320], index: 5, kind: input, shape index: {}]   ;;  %s1914_s6 = inlined_call_operand.vmem [shape: f32[6,64,64], index: 6, kind: input, shape index: {}]   ;;  %s1915_s7 = inlined_call_operand.vmem [shape: f32[7,64], index: 7, kind: input, shape index: {}]   ;;  %s1916_s8 = inlined_call_operand.hbm [shape: f32[8,64], index: 8, kind: output, shape index: {}]  }
   0x1   :  { %v31_v0 = vld [vmem:[%s1909_s1] sm:$0xff]  ;;  %1356 = vset.pattern.permute.xlu0 %v1383_v1 }
   0x2   :  { %36 = vperm.xlu0 %1356, %v31_v0  }
   0x3   :  { %13 = vsyncpa [#allocation3], 0  ;;  %v1058_v2 = vld [vmem:[%s1911_s3] ss:$0 sm:$0xff]  ;;  %v1384_v15 = vmov 683565275  }
   0x4   :  { %v1385_v17 = vmov 2475754826   ;;  %v1386_v20 = vmov 2131351028   ;;  %v1387_v23 = vmov 2102212464  }
   0x5   :  { %v1388_v26 = vmov 920167782   ;;  %v1389_v29 = vmov 1326507024   ;;  %s1391_s11 = smov 8   ;;  %s1393_s3 = smov 64  }
   0x6   :  { %s1394_s10 = smov 80  }
  0x7d   :  { %v37_v3 = vpop.permute.xlu0 %36 }
  0x7e   :  { %v1447_v4 = vmul.f32 %v1058_v2, %v37_v3 }
  0x80   :  { %v49_v5 = vand.u32 2139095040, %v1447_v4  ;;  %v46_v9 = vand.u32 2147483647, %v1447_v4  ;;  %vm48_vm7 = vcmp.lt.s32.totalorder %v1447_v4, 0  ;;  %vm138_vm15 = vweird.f32 %v1447_v4 }
  0x82   :  { %v50_v6 = vshrl.u32 %v49_v5, 23  ;;  %v53_v12 = vand.u32 8388607, %v46_v9  ;;  %vm47_vm8 = vcmp.le.f32.partialorder %v46_v9, 0.7853982  ;;  %v318_v9 = vld [vmem:[%s1912_s4 + $0x178] sm:$0xff] }
  0x84   :  { %v1059_v7 = vadd.s32 4294967169, %v50_v6  ;;  %v54_v31 = vor.u32 8388608, %v53_v12 }
  0x86   :  { %v56_v8 = vadd.s32 1, %v1059_v7  ;;  %v94_v45 = vshll.u32 %v54_v31, 8  ;;  %v314_v31 = vld [vmem:[%s1912_s4 + $0x158] sm:$0xff] }
  0x88   :  { %vm57_vm0 = vcmp.gt.s32.totalorder %v56_v8, 0 }
  0x89   :  { %v58_v10 = vsel %vm57_vm0, %v56_v8, 0  ;;  %vm1392_vm0 = vmmov 0  }
  0x8a   :  { %v60_v11 = vand.u32 31, %v58_v10  ;;  %v59_v14 = vshrl.u32 %v58_v10, 5 }
  0x8c   :  { %v61_v13 = vsub.s32 32, %v60_v11  ;;  %v63_v16 = vshll.u32 %v1384_v15, %v60_v11  ;;  %v66_v18 = vshll.u32 %v1385_v17, %v60_v11  ;;  %v69_v22 = vshll.u32 %v1386_v20, %v60_v11 }
  0x8d   :  { %v72_v25 = vshll.u32 %v1387_v23, %v60_v11  ;;  %v75_v28 = vshll.u32 %v1388_v26, %v60_v11  ;;  %vm78_vm1 = vcmp.lt.s32.totalorder %v59_v14, 1  ;;  %vm81_vm2 = vcmp.lt.s32.totalorder %v59_v14, 4 }
  0x8e   :  { %v64_v19 = vshrl.u32 %v1385_v17, %v61_v13  ;;  %v67_v21 = vshrl.u32 %v1386_v20, %v61_v13  ;;  %v70_v24 = vshrl.u32 %v1387_v23, %v61_v13  ;;  %v73_v27 = vshrl.u32 %v1388_v26, %v61_v13 }
  0x8f   :  { %v76_v30 = vshrl.u32 %v1389_v29, %v61_v13  ;;  %v62_v40 = vshrl.u32 %v1384_v15, %v61_v13  ;;  %vm80_vm3 = vcmp.lt.s32.totalorder %v59_v14, 3  ;;  %vm79_vm4 = vcmp.lt.s32.totalorder %v59_v14, 2 }
  0x90   :  { %v65_v32 = vor.u32 %v64_v19, %v63_v16  ;;  %v68_v33 = vor.u32 %v67_v21, %v66_v18  ;;  %v71_v34 = vor.u32 %v70_v24, %v69_v22  ;;  %v74_v35 = vor.u32 %v73_v27, %v72_v25  ;;  %v317_v27 = vld [vmem:[%s1912_s4 + $0x170] sm:$0xff] }
  0x91   :  { %v77_v36 = vor.u32 %v76_v30, %v75_v28  ;;  %v316_v28 = vld [vmem:[%s1912_s4 + $0x168] sm:$0xff]  ;;  %336 = vmatprep.subr.mxu0 %v317_v27  ;;  %v1390_v30 = vmov 0.0  }
  0x92   :  { %v83_v37 = vsel %vm81_vm2, %v71_v34, 2102212464  ;;  %v86_v38 = vsel %vm78_vm1, %v65_v32, %v68_v33  ;;  %v90_v39 = vsel %vm78_vm1, %v68_v33, %v71_v34  ;;  %v87_v41 = vsel %vm81_vm2, %v74_v35, 920167782  ;;  %1190 = vmatprep.subr.mxu1 %v1390_v30  ;;  %337 = vmatpush1.msra.mxu0 %v316_v28  ;;  %v30_v28 = vld [vmem:[%s1908_s0] sm:$0xff] }
  0x93   :  { %v91_v42 = vsel %vm81_vm2, %v77_v36, 1326507024  ;;  %v88_v43 = vsel %vm80_vm3, %v71_v34, %v87_v41  ;;  %v82_v46 = vsel %vm78_vm1, %v62_v40, %v65_v32  ;;  %v84_v47 = vsel %vm80_vm3, %v68_v33, %v83_v37  ;;  %v313_v32 = vld [vmem:[%s1912_s4 + $0x150] sm:$0xff]  ;;  %v315_v33 = vld [vmem:[%s1912_s4 + $0x160] sm:$0xff]  ;;  %1191 = vmatpush3.msra.mxu1 %v318_v9  ;;  %338 = vmatprep.subr.mxu0 %v314_v31  ;;  %v485_v31 = vld [vmem:[%s1914_s6 + $0x38] sm:$0xff] }
  0x94   :  { %v92_v44 = vsel %vm80_vm3, %v74_v35, %v91_v42  ;;  %v89_v48 = vsel %vm79_vm4, %v86_v38, %v88_v43  ;;  %v85_v54 = vsel %vm79_vm4, %v82_v46, %v84_v47  ;;  %v311_v36 = vld [vmem:[%s1912_s4 + $0x140] sm:$0xff]  ;;  %1192 = vmatprep.subr.mxu1 %v1390_v30  ;;  %v310_v38 = vld [vmem:[%s1912_s4 + $0x138] sm:$0xff]  ;;  %339 = vmatpush1.msra.mxu0 %v313_v32  ;;  %v308_v42 = vld [vmem:[%s1912_s4 + $0x128] sm:$0xff]  ;;  %vm257_vm1 = vcmask 64512  }
  0x95   :  { %v93_v49 = vsel %vm79_vm4, %v90_v39, %v92_v44  ;;  %v1456_v52 = vmul.u32.u64.low %v94_v45, %v89_v48  ;;  %v1457_v53 = vmul.u32.u64.high %v94_v45, %v89_v48, %v1456_v52  ;;  %v101_v56 = vmul.u32 %v94_v45, %v85_v54  ;;  %v312_v39 = vld [vmem:[%s1912_s4 + $0x148] sm:$0xff]  ;;  %1193 = vmatpush3.msra.mxu1 %v315_v33  ;;  %340 = vmatprep.subr.mxu0 %v311_v36  ;;  %v309_v48 = vld [vmem:[%s1912_s4 + $0x130] sm:$0xff]  ;;  %v481_v36 = vld [vmem:[%s1914_s6 + $0x18] sm:$0xff] }
  0x96   :  { %v1453_v50 = vmul.u32.u64.low %v94_v45, %v93_v49  ;;  %v1454_v51 = vmul.u32.u64.high %v94_v45, %v93_v49, %v1453_v50  ;;  %1194 = vmatprep.subr.mxu1 %v1390_v30  ;;  %v307_v45 = vld [vmem:[%s1912_s4 + $0x120] sm:$0xff]  ;;  %341 = vmatpush1.msra.mxu0 %v310_v38  ;;  %v305_v49 = vld [vmem:[%s1912_s4 + $0x110] sm:$0xff]  ;;  %vm267_vm2 = vcmask 523264   ;;  %vm269_vm3 = vcmask 654336   ;;  %v479_v38 = vld [vmem:[%s1914_s6 + $0x8] sm:$0xff] }
  0x97   :  { %v104_v55 = vadd.s32 1, %v1457_v53  ;;  %1195 = vmatpush3.msra.mxu1 %v312_v39  ;;  %342 = vmatprep.subr.mxu0 %v308_v42  ;;  %v301_v54 = vld [vmem:[%s1912_s4 + $0xf0] sm:$0xff]  ;;  %v478_v39 = vld [vmem:[%s1914_s6] sm:$0xff] }
  0x98   :  { %vm103_vm5 = vc.u32 %v1454_v51, %v1456_v52  ;;  %v102_v5 = vadd.s32 %v1456_v52, %v1454_v51  ;;  %1196 = vmatprep.subr.mxu1 %v1390_v30  ;;  %343 = vmatpush1.msra.mxu0 %v307_v45  ;;  %v306_v52 = vld [vmem:[%s1912_s4 + $0x118] sm:$0xff]  ;;  %v484_v33 = vld [vmem:[%s1914_s6 + $0x30] sm:$0xff] }
  0x99   :  { %v105_v57 = vsel %vm103_vm5, %v104_v55, %v1457_v53  ;;  %v302_v53 = vld [vmem:[%s1912_s4 + $0xf8] sm:$0xff]  ;;  %1197 = vmatpush3.msra.mxu1 %v309_v48  ;;  %344 = vmatprep.subr.mxu0 %v305_v49  ;;  %v303_v55 = vld [vmem:[%s1912_s4 + $0x100] sm:$0xff] }
  0x9a   :  { %v106_v58 = vadd.s32 %v105_v57, %v101_v56  ;;  %1198 = vmatprep.subr.mxu1 %v1390_v30  ;;  %v299_v56 = vld [vmem:[%s1912_s4 + $0xe0] sm:$0xff]  ;;  %v298_v57 = vld [vmem:[%s1912_s4 + $0xd8] sm:$0xff]  ;;  %400 = vmatprep.mubr.f32.mxu0 %v1390_v30 }
  0x9b   :  { %1199 = vmatpush3.msra.mxu1 %v306_v52  ;;  %1222 = vmatprep.mubr.msk.f32.mxu1 %vm1392_vm0, %v1390_v30 }
  0x9c   :  { %v107_v59 = vadd.s32 536870912, %v106_v58  ;;  %1200 = vmatprep.subr.mxu1 %v1390_v30 }
  0x9d   :  { %1201 = vmatpush3.msra.mxu1 %v303_v55  ;;  %v1074_v55 = vld [vmem:[%s1914_s6 + $0x68] sm:$0xff] }
  0x9e   :  { %v108_v60 = vshrl.u32 %v107_v59, 30  ;;  %v296_v59 = vld [vmem:[%s1912_s4 + $0xc8] sm:$0xff]  ;;  %1202 = vmatprep.subr.mxu1 %v1390_v30 }
  0xa0   :  { %v109_v61 = vshll.u32 %v108_v60, 30  ;;  %v132_v19 = vsub.s32 4, %v108_v60 }
  0xa2   :  { %v110_v62 = vsub.s32 %v106_v58, %v109_v61  ;;  %v133_v22 = vsel %vm48_vm7, %v132_v19, %v108_v60  ;;  %v300_v58 = vld [vmem:[%s1912_s4 + $0xe8] sm:$0xff]  ;;  %v295_v60 = vld [vmem:[%s1912_s4 + $0xc0] sm:$0xff]  ;;  %v297_v61 = vld [vmem:[%s1912_s4 + $0xd0] sm:$0xff] }
  0xa3   :  { %v135_v23 = vsel %vm47_vm8, 0, %v133_v22  ;;  %1203 = vmatpush3.msra.mxu1 %v300_v58  ;;  %v274_v19 = vld [vmem:[%s1912_s4 + $0x18] sm:$0xff]  ;;  %v271_v22 = vld [vmem:[%s1912_s4] sm:$0xff] }
  0xa4   :  { %v112_v63 = vsub.s32 0, %v110_v62  ;;  %v139_v24 = vadd.s32 3, %v135_v23  ;;  %v243_v25 = vand.u32 3, %v135_v23  ;;  %1204 = vmatprep.subr.mxu1 %v1390_v30  ;;  %v273_v23 = vld [vmem:[%s1912_s4 + $0x10] sm:$0xff] }
  0xa5   :  { %1205 = vmatpush3.msra.mxu1 %v297_v61 }
  0xa6   :  { %v1060_v0 = vmin.u32 %v112_v63, %v110_v62  ;;  %v140_v26 = vand.u32 3, %v139_v24  ;;  %vm248_vm9 = vcmp.eq.s32.totalorder %v243_v25, 2  ;;  %vm245_vm11 = vcmp.eq.s32.totalorder %v243_v25, 0  ;;  %v292_v63 = vld [vmem:[%s1912_s4 + $0xa8] sm:$0xff]  ;;  %1206 = vmatprep.subr.mxu1 %v1390_v30 }
  0xa7   :  { %vm244_vm13 = vcmp.lt.s32.totalorder %v243_v25, 2 }
  0xa8   :  { %v114_v1 = vclz %v1060_v0  ;;  %vm145_vm10 = vcmp.eq.s32.totalorder %v140_v26, 2  ;;  %vm142_vm12 = vcmp.eq.s32.totalorder %v140_v26, 0  ;;  %vm141_vm14 = vcmp.lt.s32.totalorder %v140_v26, 2  ;;  %v294_v0 = vld [vmem:[%s1912_s4 + $0xb8] sm:$0xff]  ;;  %v32_v26 = vld [vmem:[%s1910_s2] sm:$0xff]  ;;  %s1395_s2 = smov [#allocation2]  }
  0xa9   :  { %1207 = vmatpush3.msra.mxu1 %v294_v0  ;;  %v1069_v0 = vld [vmem:[%s1914_s6 + $0x40] sm:$0xff]  ;;  %s1050_s15 = sshll.u32 %s1395_s2, 4  ;;  %s1051_s15 = int_to_ptr.vmem [resolvable:$true] %s1050_s15 }
  0xaa   :  { %v1061_v2 = vadd.s32 4294967294, %v114_v1  ;;  %v290_v1 = vld [vmem:[%s1912_s4 + $0x98] sm:$0xff]  ;;  %1208 = vmatprep.subr.mxu1 %v1390_v30  ;;  %p1366_p1 = scmp.lt.s32.totalorder %s1051_s15, %s1051_s15 }
  0xac   :  { %vm1062_vm6 = vcmp.lt.s32.totalorder %v1061_v2, 0 }
  0xad   :  { %v117_v3 = vsel %vm1062_vm6, 0, %v1061_v2  ;;  %v289_v2 = vld [vmem:[%s1912_s4 + $0x90] sm:$0xff] }
  0xae   :  { %v118_v6 = vsub.s32 32, %v117_v3  ;;  %v122_v7 = vsub.s32 4294967266, %v117_v3  ;;  %v119_v8 = vshll.u32 %v110_v62, %v117_v3  ;;  %v293_v62 = vld [vmem:[%s1912_s4 + $0xb0] sm:$0xff]  ;;  %v291_v3 = vld [vmem:[%s1912_s4 + $0xa0] sm:$0xff] }
  0xaf   :  { %1209 = vmatpush3.msra.mxu1 %v291_v3  ;;  %v1084_v3 = vld [vmem:[%s1914_s6 + $0xa8] sm:$0xff] }
  0xb0   :  { %v120_v10 = vshrl.u32 %v102_v5, %v118_v6  ;;  %v123_v11 = vadd.s32 127, %v122_v7  ;;  %v287_v5 = vld [vmem:[%s1912_s4 + $0x80] sm:$0xff]  ;;  %v286_v6 = vld [vmem:[%s1912_s4 + $0x78] sm:$0xff]  ;;  %v288_v7 = vld [vmem:[%s1912_s4 + $0x88] sm:$0xff]  ;;  %1210 = vmatprep.subr.mxu1 %v1390_v30 }
  0xb1   :  { %1211 = vmatpush3.msra.mxu1 %v288_v7 }
  0xb2   :  { %v121_v12 = vor.u32 %v120_v10, %v119_v8  ;;  %v124_v13 = vshll.u32 %v123_v11, 23  ;;  %v284_v8 = vld [vmem:[%s1912_s4 + $0x68] sm:$0xff]  ;;  %v283_v10 = vld [vmem:[%s1912_s4 + $0x60] sm:$0xff]  ;;  %v285_v11 = vld [vmem:[%s1912_s4 + $0x70] sm:$0xff]  ;;  %1212 = vmatprep.subr.mxu1 %v1390_v30 }
  0xb3   :  { %1213 = vmatpush3.msra.mxu1 %v285_v11 }
  0xb4   :  { %v125_v14 = vor.u32 4788187, %v124_v13  ;;  %v128_v16 = vcvt.s32.f32 %v121_v12  ;;  %v281_v12 = vld [vmem:[%s1912_s4 + $0x50] sm:$0xff]  ;;  %v280_v13 = vld [vmem:[%s1912_s4 + $0x48] sm:$0xff]  ;;  %1214 = vmatprep.subr.mxu1 %v1390_v30 }
  0xb6   :  { %v126_v15 = vand.u32 2147483647, %v125_v14  ;;  %v282_v14 = vld [vmem:[%s1912_s4 + $0x58] sm:$0xff] }
  0xb7   :  { %1215 = vmatpush3.msra.mxu1 %v282_v14  ;;  %v1080_v14 = vld [vmem:[%s1914_s6 + $0x88] sm:$0xff] }
  0xb8   :  { %v129_v17 = vmul.f32 %v128_v16, %v126_v15  ;;  %v278_v15 = vld [vmem:[%s1912_s4 + $0x38] sm:$0xff]  ;;  %1216 = vmatprep.subr.mxu1 %v1390_v30  ;;  %v277_v16 = vld [vmem:[%s1912_s4 + $0x30] sm:$0xff] }
  0xba   :  { %v130_v18 = vxor.u32 2147483648, %v129_v17 }
  0xbc   :  { %v131_v20 = vsel %vm48_vm7, %v130_v18, %v129_v17  ;;  %v279_v17 = vld [vmem:[%s1912_s4 + $0x40] sm:$0xff] }
  0xbd   :  { %v134_v21 = vsel %vm47_vm8, %v1447_v4, %v131_v20  ;;  %v304_v4 = vld [vmem:[%s1912_s4 + $0x108] sm:$0xff]  ;;  %v275_v18 = vld [vmem:[%s1912_s4 + $0x20] sm:$0xff]  ;;  %1217 = vmatpush3.msra.mxu1 %v279_v17 }
  0xbe   :  { %1357 = vcosq.f32 %v134_v21  ;;  %345 = vmatpush1.msra.mxu0 %v304_v4  ;;  %v276_v20 = vld [vmem:[%s1912_s4 + $0x28] sm:$0xff]  ;;  %1218 = vmatprep.subr.mxu1 %v1390_v30 }
  0xbf   :  { %1359 = vsinq.f32 %v134_v21  ;;  %346 = vmatprep.subr.mxu0 %v302_v53  ;;  %v272_v21 = vld [vmem:[%s1912_s4 + $0x8] sm:$0xff]  ;;  %1219 = vmatpush3.msra.mxu1 %v276_v20  ;;  %v1076_v53 = vld [vmem:[%s1914_s6 + $0x78] sm:$0xff] }
  0xc0   :  { %347 = vmatpush1.msra.mxu0 %v301_v54  ;;  %1220 = vmatprep.subr.mxu1 %v1390_v30  ;;  %v1075_v54 = vld [vmem:[%s1914_s6 + $0x70] sm:$0xff] }
  0xc1   :  { %348 = vmatprep.subr.mxu0 %v299_v56  ;;  %1221 = vmatpush3.msra.mxu1 %v273_v23  ;;  %v1067_v56 = vld [vmem:[%s1915_s7 + $0x1] ss:$0 sm:$0xff]  ;;  %v1096_v23 = vld [vmem:[%s1914_s6 + $0xf8] sm:$0xff] }
  0xc2   :  { %349 = vmatpush1.msra.mxu0 %v298_v57  ;;  %1244 = vmatprep.subr.mxu1 %v1390_v30  ;;  %v1073_v57 = vld [vmem:[%s1914_s6 + $0x60] sm:$0xff] }
  0xc3   :  { %350 = vmatprep.subr.mxu0 %v296_v59  ;;  %v1072_v59 = vld [vmem:[%s1914_s6 + $0x58] sm:$0xff] }
  0xc4   :  { %351 = vmatpush1.msra.mxu0 %v295_v60 }
  0xc5   :  { %352 = vmatprep.subr.mxu0 %v293_v62  ;;  %v1071_v62 = vld [vmem:[%s1914_s6 + $0x50] sm:$0xff] }
  0xc6   :  { %353 = vmatpush1.msra.mxu0 %v292_v63  ;;  %v1070_v63 = vld [vmem:[%s1914_s6 + $0x48] sm:$0xff] }
  0xc7   :  { %354 = vmatprep.subr.mxu0 %v290_v1  ;;  %v1086_v1 = vld [vmem:[%s1914_s6 + $0xb8] sm:$0xff] }
  0xc8   :  { %355 = vmatpush1.msra.mxu0 %v289_v2  ;;  %v1085_v2 = vld [vmem:[%s1914_s6 + $0xb0] sm:$0xff] }
  0xc9   :  { %356 = vmatprep.subr.mxu0 %v287_v5  ;;  %v1083_v5 = vld [vmem:[%s1914_s6 + $0xa0] sm:$0xff] }
  0xca   :  { %357 = vmatpush1.msra.mxu0 %v286_v6  ;;  %v1082_v6 = vld [vmem:[%s1914_s6 + $0x98] sm:$0xff] }
  0xcb   :  { %v1358_v29 = vpop.eup %1357  ;;  %358 = vmatprep.subr.mxu0 %v284_v8 }
  0xcc   :  { %v1360_v34 = vpop.eup %1359  ;;  %v146_v35 = vxor.u32 2147483648, %v1358_v29  ;;  %359 = vmatpush1.msra.mxu0 %v283_v10 }
  0xcd   :  { %v143_v37 = vxor.u32 2147483648, %v1360_v34  ;;  %360 = vmatprep.subr.mxu0 %v281_v12 }
  0xce   :  { %v250_v40 = vsel %vm248_vm9, %v146_v35, %v1360_v34  ;;  %v147_v41 = vsel %vm145_vm10, %v146_v35, %v1360_v34  ;;  %361 = vmatpush1.msra.mxu0 %v280_v13  ;;  %v483_v34 = vld [vmem:[%s1914_s6 + $0x28] sm:$0xff]  ;;  %v482_v35 = vld [vmem:[%s1914_s6 + $0x20] sm:$0xff]  ;;  %v1081_v13 = vld [vmem:[%s1914_s6 + $0x90] sm:$0xff] }
  0xcf   :  { %v247_v43 = vsel %vm245_vm11, %v1358_v29, %v143_v37  ;;  %v144_v44 = vsel %vm142_vm12, %v1358_v29, %v143_v37  ;;  %362 = vmatprep.subr.mxu0 %v278_v15  ;;  %v480_v37 = vld [vmem:[%s1914_s6 + $0x10] sm:$0xff]  ;;  %v1079_v15 = vld [vmem:[%s1914_s6 + $0x80] sm:$0xff] }
  0xd0   :  { %v251_v46 = vsel %vm244_vm13, %v247_v43, %v250_v40  ;;  %v148_v47 = vsel %vm141_vm14, %v144_v44, %v147_v41  ;;  %363 = vmatpush1.msra.mxu0 %v277_v16  ;;  %v321_v40 = vlaneseq  ;;  %v1686_v43 = vld [vmem:[%s1913_s5] sm:$0x7] }
  0xd1   :  { %v252_v50 = vsel %vm138_vm15, nan, %v251_v46  ;;  %v1510_v51 = vsel %vm138_vm15, nan, %v148_v47  ;;  %364 = vmatprep.subr.mxu0 %v275_v18  ;;  %v1077_v16 = vld [vmem:[%s1915_s7 + $0x2] ss:$0 sm:$0xff] }
  0xd2   :  { %254 = vrot.lane.b32.xlu0 %v252_v50, %s1391_s11  ;;  %365 = vmatpush1.msra.mxu0 %v274_v19  ;;  %v1680_v41 = vshrl.u32 %v321_v40, 7  ;;  %v1103_v40 = vld [vmem:[%s1914_s6 + $0x120] sm:$0xff] }
  0xd3   :  { %366 = vmatprep.subr.mxu0 %v272_v21  ;;  %v1088_v21 = vld [vmem:[%s1915_s7 + $0x3] ss:$0 sm:$0xff] }
  0xd4   :  { %367 = vmatpush1.msra.mxu0 %v271_v22  ;;  %v323_v42 = vsub.s32 0, %v1680_v41  ;;  %v327_v44 = vsub.s32 1, %v1680_v41  ;;  %v331_v22 = vsub.s32 2, %v1680_v41 }
  0xd5   :  { %1225 = vmatprep.subr.mxu0 %v1390_v30 }
  0xd6   :  { %v324_v45 = vrot.slane %v1686_v43, %v323_v42  ;;  %v328_v46 = vrot.slane %v1686_v43, %v327_v44  ;;  %v1102_v42 = vld [vmem:[%s1914_s6 + $0x118] sm:$0xff] }
 0x144   :  { %v255_v24 = vpop.permute.xlu0 %254 }
 0x145   :  { %v258_v25 = vsel %vm257_vm1, %v1510_v51, %v255_v24  ;;  %v1095_v24 = vld [vmem:[%s1914_s6 + $0xf0] sm:$0xff] }
 0x146   :  { %260 = vrot.lane.b32.xlu1 %v258_v25, %s1393_s3  ;;  %v1094_v25 = vld [vmem:[%s1914_s6 + $0xe8] sm:$0xff] }
 0x14a   :  { %264 = vrot.lane.b32.xlu1 %v32_v26, %s1394_s10  ;;  %v332_v26 = vrot.slane %v1686_v43, %v331_v22 }
 0x1b8   :  { %v261_v27 = vpop.permute.xlu1 %260 }
 0x1b9   :  { %v268_v9 = vsel %vm267_vm2, %v30_v28, %v261_v27  ;;  %v1093_v28 = vld [vmem:[%s1914_s6 + $0xe0] sm:$0xff] }
 0x1bc   :  { %v265_v29 = vpop.permute.xlu1 %264 }
 0x1bd   :  { %v270_v32 = vsel %vm269_vm3, %v268_v9, %v265_v29  ;;  %v1092_v29 = vld [vmem:[%s1914_s6 + $0xd8] sm:$0xff] }
 0x1be   :  { %401 = vmatmul.mubr.f32.vlgmr.msra.gmra.mxu0 %v270_v32  ;;  %1223 = vmatmul.mubr.f32.vlgmr.msra.gmra.mxu1 %v270_v32  ;;  %v1091_v32 = vld [vmem:[%s1914_s6 + $0xd0] sm:$0xff] }
 0x1bf   :  { %1226 = vmatpush3.msra.mxu0 %v485_v31  ;;  %1241 = vmatprep.mubr.msk.f32.mxu0 %vm1392_vm0, %v1390_v30 }
 0x1c0   :  { %1227 = vmatprep.subr.mxu0 %v1390_v30  ;;  %1260 = vmatprep.mubr.msk.f32.mxu1 %vm1392_vm0, %v1390_v30 }
 0x1c1   :  { %1228 = vmatpush3.msra.mxu0 %v484_v33  ;;  %1245 = vmatpush3.msra.mxu1 %v1076_v53  ;;  %v1090_v33 = vld [vmem:[%s1914_s6 + $0xc8] sm:$0xff] }
 0x1c2   :  { %1229 = vmatprep.subr.mxu0 %v1390_v30  ;;  %1246 = vmatprep.subr.mxu1 %v1390_v30 }
 0x1c3   :  { %1230 = vmatpush3.msra.mxu0 %v483_v34  ;;  %1247 = vmatpush3.msra.mxu1 %v1075_v54  ;;  %v1089_v34 = vld [vmem:[%s1914_s6 + $0xc0] sm:$0xff] }
 0x1c4   :  { %1231 = vmatprep.subr.mxu0 %v1390_v30  ;;  %1248 = vmatprep.subr.mxu1 %v1390_v30 }
 0x1c5   :  { %1232 = vmatpush3.msra.mxu0 %v482_v35  ;;  %1249 = vmatpush3.msra.mxu1 %v1074_v55  ;;  %v1106_v35 = vld [vmem:[%s1914_s6 + $0x138] sm:$0xff]  ;;  %v1108_v55 = vld [vmem:[%s1915_s7 + $0x5] ss:$0 sm:$0xff] }
 0x1c6   :  { %1233 = vmatprep.subr.mxu0 %v1390_v30  ;;  %1250 = vmatprep.subr.mxu1 %v1390_v30 }
 0x1c7   :  { %1234 = vmatpush3.msra.mxu0 %v481_v36  ;;  %1251 = vmatpush3.msra.mxu1 %v1073_v57  ;;  %v1105_v36 = vld [vmem:[%s1914_s6 + $0x130] sm:$0xff] }
 0x1c8   :  { %1235 = vmatprep.subr.mxu0 %v1390_v30  ;;  %1252 = vmatprep.subr.mxu1 %v1390_v30  ;;  %v1115_v57 = vld [vmem:[%s1914_s6 + $0x170] sm:$0xff] }
 0x1c9   :  { %1236 = vmatpush3.msra.mxu0 %v480_v37  ;;  %1253 = vmatpush3.msra.mxu1 %v1072_v59  ;;  %v1104_v37 = vld [vmem:[%s1914_s6 + $0x128] sm:$0xff]  ;;  %v1113_v59 = vld [vmem:[%s1914_s6 + $0x160] sm:$0xff] }
 0x1ca   :  { %1237 = vmatprep.subr.mxu0 %v1390_v30  ;;  %1254 = vmatprep.subr.mxu1 %v1390_v30 }
 0x1cb   :  { %1238 = vmatpush3.msra.mxu0 %v479_v38  ;;  %1255 = vmatpush3.msra.mxu1 %v1071_v62  ;;  %v1111_v62 = vld [vmem:[%s1914_s6 + $0x150] sm:$0xff] }
 0x1cc   :  { %1239 = vmatprep.subr.mxu0 %v1390_v30  ;;  %1256 = vmatprep.subr.mxu1 %v1390_v30 }
 0x1cd   :  { %1240 = vmatpush3.msra.mxu0 %v478_v39  ;;  %1257 = vmatpush3.msra.mxu1 %v1070_v63 }
 0x1ce   :  { %1263 = vmatprep.subr.mxu0 %v1390_v30  ;;  %1258 = vmatprep.subr.mxu1 %v1390_v30 }
 0x1cf   :  { %1259 = vmatpush3.msra.mxu1 %v1069_v0  ;;  %v1110_v0 = vld [vmem:[%s1914_s6 + $0x148] sm:$0xff] }
 0x1d0   :  { %1282 = vmatprep.subr.mxu1 %v1390_v30 }
 0x27e   :  { %v402_v47 = vpop.f32.mrf.mxu0  ;;  %v1691_v48 = vpop.f32.mrf.mxu1 }
 0x27f   :  { %v403_v49 = vadd.f32 %v402_v47, %v324_v45  ;;  %v474_v31 = vadd.f32 %v1691_v48, %v332_v26  ;;  %v1101_v48 = vld [vmem:[%s1914_s6 + $0x110] sm:$0xff] }
 0x280   :  { %v404_v50 = vpop.f32.mrf.mxu0  ;;  %v1224_v51 = vpop.f32.mrf.mxu1 }
 0x281   :  { %v477_v4 = vmax.f32 %v403_v49, 0.0  ;;  %v1693_v52 = vadd.f32 %v404_v50, %v328_v46  ;;  %v1099_v50 = vld [vmem:[%s1914_s6 + $0x100] sm:$0xff] }
 0x282   :  { %v1097_v51 = vld [vmem:[%s1915_s7 + $0x4] ss:$0 sm:$0xff] }
 0x283   :  { %570 = vrot.lane.b32.xlu1 %v1693_v52, %s1393_s3  ;;  %1242 = vmatmul.mubr.msk.f32.vlgmr.msra.gmra.mxu0 %vm267_vm2, %v477_v4 }
 0x284   :  { %1279 = vmatprep.mubr.msk.f32.mxu0 %vm1392_vm0, %v1390_v30  ;;  %1264 = vmatpush3.msra.mxu0 %v1086_v1  ;;  %v1109_v1 = vld [vmem:[%s1914_s6 + $0x140] sm:$0xff] }
 0x285   :  { %1265 = vmatprep.subr.mxu0 %v1390_v30 }
 0x286   :  { %1266 = vmatpush3.msra.mxu0 %v1085_v2 }
 0x287   :  { %1267 = vmatprep.subr.mxu0 %v1390_v30 }
 0x288   :  { %1268 = vmatpush3.msra.mxu0 %v1084_v3 }
 0x289   :  { %1269 = vmatprep.subr.mxu0 %v1390_v30 }
 0x28a   :  { %1270 = vmatpush3.msra.mxu0 %v1083_v5 }
 0x28b   :  { %1271 = vmatprep.subr.mxu0 %v1390_v30 }
 0x28c   :  { %1272 = vmatpush3.msra.mxu0 %v1082_v6 }
 0x28d   :  { %1273 = vmatprep.subr.mxu0 %v1390_v30 }
 0x28e   :  { %1274 = vmatpush3.msra.mxu0 %v1081_v13 }
 0x28f   :  { %1275 = vmatprep.subr.mxu0 %v1390_v30 }
 0x290   :  { %1276 = vmatpush3.msra.mxu0 %v1080_v14 }
 0x291   :  { %1277 = vmatprep.subr.mxu0 %v1390_v30 }
 0x292   :  { %1278 = vmatpush3.msra.mxu0 %v1079_v15 }
 0x293   :  { %1301 = vmatprep.subr.mxu0 %v1390_v30 }
 0x2f5   :  { %v571_v10 = vpop.permute.xlu1 %570 }
 0x343   :  { %v560_v58 = vpop.f32.mrf.mxu0 }
 0x344   :  { %v561_v60 = vadd.f32 %v1067_v56, %v560_v58  ;;  %v1116_v56 = vld [vmem:[%s1914_s6 + $0x178] sm:$0xff]  ;;  %v1114_v58 = vld [vmem:[%s1914_s6 + $0x168] sm:$0xff] }
 0x345   :  { %v1243_v61 = vpop.f32.mrf.mxu0 }
 0x346   :  { %565 = vrot.lane.b32.xlu0 %v561_v60, %s1393_s3  ;;  %v1112_v60 = vld [vmem:[%s1914_s6 + $0x158] sm:$0xff] }
 0x3b8   :  { %v566_v7 = vpop.permute.xlu0 %565 }
 0x3b9   :  { %v568_v8 = vmul.f32 %v566_v7, %v403_v49  ;;  %v1100_v49 = vld [vmem:[%s1914_s6 + $0x108] sm:$0xff]  ;;  %s1361_s6 = scalar_lea.vmem %s1051_s15, 128 }
 0x3ba   :  { %p1362_p0 = scmp.ne.s32.totalorder %s1051_s15, %s1361_s6  ;;  %p1367_p2 = scmp.lt.s32.totalorder %s1361_s6, %s1361_s6 }
 0x3bb   :  { %v1756_v11 = vadd.f32 %v571_v10, %v568_v8  ;;  %v1117_v8 = vld [vmem:[%s1915_s7 + $0x6] ss:$0 sm:$0xff] }
 0x3bc   :  { %p1368_p3 = por %p1367_p2, %p1366_p1 }
 0x3bd   :  { %589 = vrot.lane.b32.xlu0 %v1756_v11, %s1393_s3 }
 0x3be   :  { %p1369_p4 = pnand %p1368_p3, %p1362_p0 }
 0x3c1   :  { %757 = vrot.lane.b32.xlu0 %v1088_v21, %s1393_s3 }
 0x42f   :  { %v590_v12 = vpop.permute.xlu0 %589 }
 0x430   :  { %1261 = vmatmul.mubr.msk.f32.vlgmr.msra.gmra.mxu1 %vm267_vm2, %v590_v12 }
 0x431   :  { %1298 = vmatprep.mubr.msk.f32.mxu1 %vm1392_vm0, %v1390_v30  ;;  %1283 = vmatpush3.msra.mxu1 %v1096_v23 }
 0x432   :  { %1284 = vmatprep.subr.mxu1 %v1390_v30 }
 0x433   :  { %1285 = vmatpush3.msra.mxu1 %v1095_v24  ;;  %v758_v39 = vpop.permute.xlu0 %757 }
 0x434   :  { %1286 = vmatprep.subr.mxu1 %v1390_v30 }
 0x435   :  { %1287 = vmatpush3.msra.mxu1 %v1094_v25 }
 0x436   :  { %1288 = vmatprep.subr.mxu1 %v1390_v30 }
 0x437   :  { %1289 = vmatpush3.msra.mxu1 %v1093_v28 }
 0x438   :  { %1290 = vmatprep.subr.mxu1 %v1390_v30 }
 0x439   :  { %1291 = vmatpush3.msra.mxu1 %v1092_v29 }
 0x43a   :  { %1292 = vmatprep.subr.mxu1 %v1390_v30 }
 0x43b   :  { %1293 = vmatpush3.msra.mxu1 %v1091_v32 }
 0x43c   :  { %1294 = vmatprep.subr.mxu1 %v1390_v30 }
 0x43d   :  { %1295 = vmatpush3.msra.mxu1 %v1090_v33 }
 0x43e   :  { %1296 = vmatprep.subr.mxu1 %v1390_v30 }
 0x43f   :  { %1297 = vmatpush3.msra.mxu1 %v1089_v34 }
 0x440   :  { %1320 = vmatprep.subr.mxu1 %v1390_v30 }
 0x4f0   :  { %v659_v17 = vpop.f32.mrf.mxu1 }
 0x4f1   :  { %v660_v18 = vadd.f32 %v1077_v16, %v659_v17 }
 0x4f2   :  { %v1262_v19 = vpop.f32.mrf.mxu1 }
 0x4f3   :  { %v663_v20 = vmax.f32 %v660_v18, 0.0 }
 0x4f5   :  { %1280 = vmatmul.mubr.msk.f32.vlgmr.msra.gmra.mxu0 %vm267_vm2, %v663_v20 }
 0x4f6   :  { %1317 = vmatprep.mubr.msk.f32.mxu0 %vm1392_vm0, %v1390_v30  ;;  %1302 = vmatpush3.msra.mxu0 %v1106_v35 }
 0x4f7   :  { %1303 = vmatprep.subr.mxu0 %v1390_v30 }
 0x4f8   :  { %1304 = vmatpush3.msra.mxu0 %v1105_v36 }
 0x4f9   :  { %1305 = vmatprep.subr.mxu0 %v1390_v30 }
 0x4fa   :  { %1306 = vmatpush3.msra.mxu0 %v1104_v37 }
 0x4fb   :  { %1307 = vmatprep.subr.mxu0 %v1390_v30 }
 0x4fc   :  { %1308 = vmatpush3.msra.mxu0 %v1103_v40 }
 0x4fd   :  { %1309 = vmatprep.subr.mxu0 %v1390_v30 }
 0x4fe   :  { %1310 = vmatpush3.msra.mxu0 %v1102_v42 }
 0x4ff   :  { %1311 = vmatprep.subr.mxu0 %v1390_v30 }
 0x500   :  { %1312 = vmatpush3.msra.mxu0 %v1101_v48 }
 0x501   :  { %1313 = vmatprep.subr.mxu0 %v1390_v30 }
 0x502   :  { %1314 = vmatpush3.msra.mxu0 %v1100_v49 }
 0x503   :  { %1315 = vmatprep.subr.mxu0 %v1390_v30 }
 0x504   :  { %1316 = vmatpush3.msra.mxu0 %v1099_v50 }
 0x5b5   :  { %v742_v27 = vpop.f32.mrf.mxu0 }
 0x5b6   :  { %747 = vrot.lane.b32.xlu1 %v742_v27, %s1393_s3 }
 0x5b7   :  { %v1281_v9 = vpop.f32.mrf.mxu0 }
 0x5ba   :  { %763 = vrot.lane.b32.xlu1 %v474_v31, %s1393_s3 }
 0x628   :  { %v748_v38 = vpop.permute.xlu1 %747 }
 0x629   :  { %v750_v41 = vadd.f32 %v748_v38, %v1756_v11 }
 0x62b   :  { %v760_v43 = vadd.f32 %v758_v39, %v750_v41 }
 0x62c   :  { %v764_v45 = vpop.permute.xlu1 %763 }
 0x62d   :  { %v761_v44 = vmul.f32 %v760_v43, %v1693_v52 }
 0x62f   :  { %v766_v46 = vadd.f32 %v764_v45, %v761_v44 }
 0x631   :  { %782 = vrot.lane.b32.xlu0 %v766_v46, %s1393_s3 }
 0x635   :  { %950 = vrot.lane.b32.xlu0 %v1108_v55, %s1393_s3 }
 0x6a3   :  { %v783_v47 = vpop.permute.xlu0 %782 }
 0x6a4   :  { %1299 = vmatmul.mubr.msk.f32.vlgmr.msra.gmra.mxu1 %vm267_vm2, %v783_v47 }
 0x6a5   :  { %1336 = vmatprep.mubr.msk.f32.mxu1 %vm1392_vm0, %v1390_v30  ;;  %1321 = vmatpush3.msra.mxu1 %v1116_v56 }
 0x6a6   :  { %1322 = vmatprep.subr.mxu1 %v1390_v30 }
 0x6a7   :  { %1323 = vmatpush3.msra.mxu1 %v1115_v57  ;;  %v951_v3 = vpop.permute.xlu0 %950 }
 0x6a8   :  { %1324 = vmatprep.subr.mxu1 %v1390_v30 }
 0x6a9   :  { %1325 = vmatpush3.msra.mxu1 %v1114_v58 }
 0x6aa   :  { %1326 = vmatprep.subr.mxu1 %v1390_v30 }
 0x6ab   :  { %1327 = vmatpush3.msra.mxu1 %v1113_v59 }
 0x6ac   :  { %1328 = vmatprep.subr.mxu1 %v1390_v30 }
 0x6ad   :  { %1329 = vmatpush3.msra.mxu1 %v1112_v60 }
 0x6ae   :  { %1330 = vmatprep.subr.mxu1 %v1390_v30 }
 0x6af   :  { %1331 = vmatpush3.msra.mxu1 %v1111_v62 }
 0x6b0   :  { %1332 = vmatprep.subr.mxu1 %v1390_v30 }
 0x6b1   :  { %1333 = vmatpush3.msra.mxu1 %v1110_v0 }
 0x6b2   :  { %1334 = vmatprep.subr.mxu1 %v1390_v30 }
 0x6b3   :  { %1335 = vmatpush3.msra.mxu1 %v1109_v1 }
 0x764   :  { %v852_v4 = vpop.f32.mrf.mxu1 }
 0x765   :  { %v853_v52 = vadd.f32 %v1097_v51, %v852_v4 }
 0x766   :  { %v1300_v53 = vpop.f32.mrf.mxu1 }
 0x767   :  { %v856_v54 = vmax.f32 %v853_v52, 0.0 }
 0x769   :  { %1318 = vmatmul.mubr.msk.f32.vlgmr.msra.gmra.mxu0 %vm267_vm2, %v856_v54 }
 0x829   :  { %v935_v61 = vpop.f32.mrf.mxu0 }
 0x82a   :  { %940 = vrot.lane.b32.xlu1 %v935_v61, %s1393_s3 }
 0x82b   :  { %v1319_v63 = vpop.f32.mrf.mxu0 }
 0x89c   :  { %v941_v2 = vpop.permute.xlu1 %940 }
 0x89d   :  { %v943_v5 = vadd.f32 %v941_v2, %v766_v46 }
 0x89f   :  { %v953_v6 = vadd.f32 %v951_v3, %v943_v5 }
 0x8a1   :  { %969 = vrot.lane.b32.xlu1 %v953_v6, %s1393_s3 }
 0x913   :  { %v970_v7 = vpop.permute.xlu1 %969 }
 0x914   :  { %1337 = vmatmul.mubr.msk.f32.vlgmr.msra.gmra.mxu1 %vm267_vm2, %v970_v7 }
 0x9d4   :  { %v1039_v10 = vpop.f32.mrf.mxu1 }
 0x9d5   :  { %v1040_v11 = vadd.f32 %v1117_v8, %v1039_v10 }
 0x9d6   :  { %v1338_v30 = vpop.f32.mrf.mxu1 }
 0x9d7   :  { %1043 = vst.msk [vmem:[#allocation2] sm:$0xff] %vm267_vm2, %v1040_v11 }
 0x9d8   :  { %1372 = shalt.err (!%p1369_p4)
}
 0x9d9   :  { %1053 = dma.vmem_to_hbm [thread:$0]  %s1051_s15, 128, %s1916_s8, [#allocation3]  }
 0x9da   :  { %1381 = dma.done.wait [#allocation3], 128  }
 0x9db   :  { %1382 = vsyncadd [#allocation3], 4294967168 }
 0x9dc   :  { %1057 = vsyncpa [#allocation3], 1 }

</bundles_post_ra>
